<compile_context>
chip_gen: v6e
topology: v6e:2x2x1
jax: 0.10.0
libtpu: 0.0.40
codegen_flags: <defaults>
</compile_context>

<pallas_src>
import functools
import math

import jax
import jax.numpy as jnp
from jax.experimental import pallas as pl
from jax.experimental.pallas import tpu as pltpu


def _round_up(x: int, m: int) -> int:
    return (x + m - 1) // m * m


def _prev_pow2(x: int) -> int:
    return 1 << (x.bit_length() - 1)


def _gather_kernel(ids_ref, emb_hbm, out_ref, sem, *, scale, t_blk, n_window):
    # ids_ref : (N_pad,) int32 token ids in SMEM (scalar-prefetched).
    # emb_hbm : (V, E) embedding table, left in HBM (no auto-DMA).
    # out_ref : (t_blk, E) output tile in VMEM; rows are DMA'd straight in.
    # sem     : (n_window,) DMA semaphores — one per in-flight row copy.
    base = pl.program_id(0) * t_blk

    def start(t):
        tok = ids_ref[base + t]
        pltpu.make_async_copy(
            emb_hbm.at[pl.ds(tok, 1), :],
            out_ref.at[pl.ds(t, 1), :],
            sem.at[t & (n_window - 1)],
        ).start()

    def wait(t):
        pltpu.make_async_copy(
            emb_hbm.at[pl.ds(0, 1), :],          # dummy src index; shapes/sem matter
            out_ref.at[pl.ds(t, 1), :],
            sem.at[t & (n_window - 1)],
        ).wait()

    # Prime the DMA window (small static unroll, n_window <= 32).
    for t in range(n_window):
        start(t)

    # Steady state: retire row t, then refill its slot with row t + n_window.
    @pl.loop(0, t_blk)
    def _(t):
        wait(t)

        @pl.when(t + n_window < t_blk)
        def _():
            start(t + n_window)

    # All rows resident: apply sqrt(E) scaling in place (lane-dense store).
    out_ref[...] = (out_ref[...] * scale).astype(out_ref.dtype)


def token_embedding(tokens: jax.Array, emb_table: jax.Array,
                    *, t_blk_max: int = 512, dma_window: int = 32) -> jax.Array:
    """tokens: (B, S) integer ids; emb_table: (V, E). Returns (B, S, E)."""
    B, S = tokens.shape
    V, E = emb_table.shape
    dtype = emb_table.dtype
    scale = math.sqrt(float(E))
    itemsize = jnp.dtype(dtype).itemsize

    N = B * S
    # Token-block size: large enough to amortize per-step overhead, but keep
    # the double-buffered (t_blk, E) output tile comfortably inside VMEM
    # (v7x physical VMEM is only 64 MiB).
    t_blk = min(t_blk_max, _round_up(N, 8))
    tile_cap = max(8, (24 * 1024 * 1024) // (2 * E * itemsize) // 8 * 8)
    t_blk = min(t_blk, tile_cap)
    n_pad = _round_up(N, t_blk)

    # Token ids live in SMEM via scalar prefetch. (Very long token streams
    # would need chunked prefetch; fine for typical (B, S).)
    ids = tokens.reshape(N).astype(jnp.int32)
    if n_pad != N:
        ids = jnp.pad(ids, (0, n_pad - N))       # pad ids are 0 (valid row, sliced off)

    # In-flight row-DMA window (power of two so the slot index is a cheap AND).
    n_window = min(dma_window, _prev_pow2(t_blk))

    grid = (n_pad // t_blk,)
    out_tile_bytes = t_blk * E * itemsize
    vmem_limit = int(min(48 << 20, max(32 << 20, 2 * out_tile_bytes + (1 << 20))))

    out_flat = pl.pallas_call(
        functools.partial(_gather_kernel, scale=scale, t_blk=t_blk,
                          n_window=n_window),
        out_shape=jax.ShapeDtypeStruct((n_pad, E), dtype),
        grid_spec=pltpu.PrefetchScalarGridSpec(
            num_scalar_prefetch=1,                       # ids -> SMEM
            grid=grid,
            in_specs=[pl.BlockSpec(memory_space=pl.ANY)],  # table stays in HBM
            out_specs=pl.BlockSpec((t_blk, E), lambda i, ids_ref: (i, 0)),
            scratch_shapes=[pltpu.SemaphoreType.DMA((n_window,))],
        ),
        compiler_params=pltpu.CompilerParams(
            dimension_semantics=("parallel",),
            vmem_limit_bytes=vmem_limit,
        ),
    )(ids, emb_table)

    return out_flat[:N].reshape(B, S, E)


if __name__ == "__main__":
    VOCAB_SIZE = 1000   # arbitrary vocab size (no tiling constraint anymore)
    EMB_SIZE = 128      # lane-dense output (multiple of 128 lanes)
    B, S = 2, 9         # N = 18 -> exercises token-block padding

    key = jax.random.PRNGKey(0)
    k_tok, k_emb = jax.random.split(key)

    tokens = jax.random.randint(k_tok, (B, S), 0, VOCAB_SIZE, dtype=jnp.int32)
    emb_table = jax.random.normal(k_emb, (VOCAB_SIZE, EMB_SIZE), dtype=jnp.float32)

    out = jax.block_until_ready(token_embedding(tokens, emb_table))

    # Reference: plain JAX embedding lookup * sqrt(emb_size).
    ref = jnp.take(emb_table, tokens, axis=0) * math.sqrt(float(EMB_SIZE))
    assert out.shape == (B, S, EMB_SIZE), out.shape
    # Pure gather + one f32 multiply: results should match the reference tightly.
    assert jnp.allclose(out, ref, atol=1e-6, rtol=1e-6), "mismatch vs reference"

    print("KERNEL_OK")
</pallas_src>

<mosaic_0001>
module attributes {stable_mosaic.version = 11 : i64} {
  func.func @_gather_kernel(%arg0: i32, %arg1: memref<24xi32, #tpu.memory_space<smem>>, %arg2: memref<1000x128xf32, #tpu.memory_space<any>>, %arg3: memref<24x128xf32, #tpu.memory_space<vmem>>, %arg4: memref<16x!tpu.dma_semaphore, #tpu.memory_space<semaphore_mem>>) attributes {dimension_semantics = [#tpu.dimension_semantics<parallel>], iteration_bounds = array<i64: 1>, scalar_prefetch = 1 : i64, scratch_operands = 1 : i64, tpu.core_type = #tpu.core_type<tc>, window_params = [{}, {transform_indices = @transform_1, window_bounds = array<i64: 24, 128>}]} {
    %c24_i32 = arith.constant 24 : i32
    %0 = arith.muli %arg0, %c24_i32 : i32
    %c0_i32 = arith.constant 0 : i32
    %1 = arith.addi %0, %c0_i32 : i32
    %2 = arith.index_cast %1 : i32 to index
    %3 = memref.load %arg1[%2] : memref<24xi32, #tpu.memory_space<smem>>
    %c0_i32_0 = arith.constant 0 : i32
    %c0_i32_1 = arith.constant 0 : i32
    %4 = tpu.memref_slice %arg2[%3, %c0_i32_1] : memref<1000x128xf32, #tpu.memory_space<any>> -> memref<1x128xf32, #tpu.memory_space<any>>
    %c0_i32_2 = arith.constant 0 : i32
    %c0_i32_3 = arith.constant 0 : i32
    %5 = tpu.memref_slice %arg3[%c0_i32_2, %c0_i32_3] : memref<24x128xf32, #tpu.memory_space<vmem>> -> memref<1x128xf32, #tpu.memory_space<vmem>>
    %6 = tpu.memref_slice %arg4[%c0_i32_0] : memref<16x!tpu.dma_semaphore, #tpu.memory_space<semaphore_mem>> -> memref<1x!tpu.dma_semaphore, #tpu.memory_space<semaphore_mem>>
    %7 = tpu.memref_squeeze %6 : memref<1x!tpu.dma_semaphore, #tpu.memory_space<semaphore_mem>> -> memref<!tpu.dma_semaphore, #tpu.memory_space<semaphore_mem>>
    tpu.enqueue_dma source(%4 : memref<1x128xf32, #tpu.memory_space<any>>) target(%5 : memref<1x128xf32, #tpu.memory_space<vmem>>) target_semaphore(%7 : memref<!tpu.dma_semaphore, #tpu.memory_space<semaphore_mem>>)
    %c1_i32 = arith.constant 1 : i32
    %8 = arith.addi %0, %c1_i32 : i32
    %9 = arith.index_cast %8 : i32 to index
    %10 = memref.load %arg1[%9] : memref<24xi32, #tpu.memory_space<smem>>
    %c1_i32_4 = arith.constant 1 : i32
    %c0_i32_5 = arith.constant 0 : i32
    %11 = tpu.memref_slice %arg2[%10, %c0_i32_5] : memref<1000x128xf32, #tpu.memory_space<any>> -> memref<1x128xf32, #tpu.memory_space<any>>
    %c1_i32_6 = arith.constant 1 : i32
    %c0_i32_7 = arith.constant 0 : i32
    %12 = tpu.memref_slice %arg3[%c1_i32_6, %c0_i32_7] : memref<24x128xf32, #tpu.memory_space<vmem>> -> memref<1x128xf32, #tpu.memory_space<vmem>>
    %13 = tpu.memref_slice %arg4[%c1_i32_4] : memref<16x!tpu.dma_semaphore, #tpu.memory_space<semaphore_mem>> -> memref<1x!tpu.dma_semaphore, #tpu.memory_space<semaphore_mem>>
    %14 = tpu.memref_squeeze %13 : memref<1x!tpu.dma_semaphore, #tpu.memory_space<semaphore_mem>> -> memref<!tpu.dma_semaphore, #tpu.memory_space<semaphore_mem>>
    tpu.enqueue_dma source(%11 : memref<1x128xf32, #tpu.memory_space<any>>) target(%12 : memref<1x128xf32, #tpu.memory_space<vmem>>) target_semaphore(%14 : memref<!tpu.dma_semaphore, #tpu.memory_space<semaphore_mem>>)
    %c2_i32 = arith.constant 2 : i32
    %15 = arith.addi %0, %c2_i32 : i32
    %16 = arith.index_cast %15 : i32 to index
    %17 = memref.load %arg1[%16] : memref<24xi32, #tpu.memory_space<smem>>
    %c2_i32_8 = arith.constant 2 : i32
    %c0_i32_9 = arith.constant 0 : i32
    %18 = tpu.memref_slice %arg2[%17, %c0_i32_9] : memref<1000x128xf32, #tpu.memory_space<any>> -> memref<1x128xf32, #tpu.memory_space<any>>
    %c2_i32_10 = arith.constant 2 : i32
    %c0_i32_11 = arith.constant 0 : i32
    %19 = tpu.memref_slice %arg3[%c2_i32_10, %c0_i32_11] : memref<24x128xf32, #tpu.memory_space<vmem>> -> memref<1x128xf32, #tpu.memory_space<vmem>>
    %20 = tpu.memref_slice %arg4[%c2_i32_8] : memref<16x!tpu.dma_semaphore, #tpu.memory_space<semaphore_mem>> -> memref<1x!tpu.dma_semaphore, #tpu.memory_space<semaphore_mem>>
    %21 = tpu.memref_squeeze %20 : memref<1x!tpu.dma_semaphore, #tpu.memory_space<semaphore_mem>> -> memref<!tpu.dma_semaphore, #tpu.memory_space<semaphore_mem>>
    tpu.enqueue_dma source(%18 : memref<1x128xf32, #tpu.memory_space<any>>) target(%19 : memref<1x128xf32, #tpu.memory_space<vmem>>) target_semaphore(%21 : memref<!tpu.dma_semaphore, #tpu.memory_space<semaphore_mem>>)
    %c3_i32 = arith.constant 3 : i32
    %22 = arith.addi %0, %c3_i32 : i32
    %23 = arith.index_cast %22 : i32 to index
    %24 = memref.load %arg1[%23] : memref<24xi32, #tpu.memory_space<smem>>
    %c3_i32_12 = arith.constant 3 : i32
    %c0_i32_13 = arith.constant 0 : i32
    %25 = tpu.memref_slice %arg2[%24, %c0_i32_13] : memref<1000x128xf32, #tpu.memory_space<any>> -> memref<1x128xf32, #tpu.memory_space<any>>
    %c3_i32_14 = arith.constant 3 : i32
    %c0_i32_15 = arith.constant 0 : i32
    %26 = tpu.memref_slice %arg3[%c3_i32_14, %c0_i32_15] : memref<24x128xf32, #tpu.memory_space<vmem>> -> memref<1x128xf32, #tpu.memory_space<vmem>>
    %27 = tpu.memref_slice %arg4[%c3_i32_12] : memref<16x!tpu.dma_semaphore, #tpu.memory_space<semaphore_mem>> -> memref<1x!tpu.dma_semaphore, #tpu.memory_space<semaphore_mem>>
    %28 = tpu.memref_squeeze %27 : memref<1x!tpu.dma_semaphore, #tpu.memory_space<semaphore_mem>> -> memref<!tpu.dma_semaphore, #tpu.memory_space<semaphore_mem>>
    tpu.enqueue_dma source(%25 : memref<1x128xf32, #tpu.memory_space<any>>) target(%26 : memref<1x128xf32, #tpu.memory_space<vmem>>) target_semaphore(%28 : memref<!tpu.dma_semaphore, #tpu.memory_space<semaphore_mem>>)
    %c4_i32 = arith.constant 4 : i32
    %29 = arith.addi %0, %c4_i32 : i32
    %30 = arith.index_cast %29 : i32 to index
    %31 = memref.load %arg1[%30] : memref<24xi32, #tpu.memory_space<smem>>
    %c4_i32_16 = arith.constant 4 : i32
    %c0_i32_17 = arith.constant 0 : i32
    %32 = tpu.memref_slice %arg2[%31, %c0_i32_17] : memref<1000x128xf32, #tpu.memory_space<any>> -> memref<1x128xf32, #tpu.memory_space<any>>
    %c4_i32_18 = arith.constant 4 : i32
    %c0_i32_19 = arith.constant 0 : i32
    %33 = tpu.memref_slice %arg3[%c4_i32_18, %c0_i32_19] : memref<24x128xf32, #tpu.memory_space<vmem>> -> memref<1x128xf32, #tpu.memory_space<vmem>>
    %34 = tpu.memref_slice %arg4[%c4_i32_16] : memref<16x!tpu.dma_semaphore, #tpu.memory_space<semaphore_mem>> -> memref<1x!tpu.dma_semaphore, #tpu.memory_space<semaphore_mem>>
    %35 = tpu.memref_squeeze %34 : memref<1x!tpu.dma_semaphore, #tpu.memory_space<semaphore_mem>> -> memref<!tpu.dma_semaphore, #tpu.memory_space<semaphore_mem>>
    tpu.enqueue_dma source(%32 : memref<1x128xf32, #tpu.memory_space<any>>) target(%33 : memref<1x128xf32, #tpu.memory_space<vmem>>) target_semaphore(%35 : memref<!tpu.dma_semaphore, #tpu.memory_space<semaphore_mem>>)
    %c5_i32 = arith.constant 5 : i32
    %36 = arith.addi %0, %c5_i32 : i32
    %37 = arith.index_cast %36 : i32 to index
    %38 = memref.load %arg1[%37] : memref<24xi32, #tpu.memory_space<smem>>
    %c5_i32_20 = arith.constant 5 : i32
    %c0_i32_21 = arith.constant 0 : i32
    %39 = tpu.memref_slice %arg2[%38, %c0_i32_21] : memref<1000x128xf32, #tpu.memory_space<any>> -> memref<1x128xf32, #tpu.memory_space<any>>
    %c5_i32_22 = arith.constant 5 : i32
    %c0_i32_23 = arith.constant 0 : i32
    %40 = tpu.memref_slice %arg3[%c5_i32_22, %c0_i32_23] : memref<24x128xf32, #tpu.memory_space<vmem>> -> memref<1x128xf32, #tpu.memory_space<vmem>>
    %41 = tpu.memref_slice %arg4[%c5_i32_20] : memref<16x!tpu.dma_semaphore, #tpu.memory_space<semaphore_mem>> -> memref<1x!tpu.dma_semaphore, #tpu.memory_space<semaphore_mem>>
    %42 = tpu.memref_squeeze %41 : memref<1x!tpu.dma_semaphore, #tpu.memory_space<semaphore_mem>> -> memref<!tpu.dma_semaphore, #tpu.memory_space<semaphore_mem>>
    tpu.enqueue_dma source(%39 : memref<1x128xf32, #tpu.memory_space<any>>) target(%40 : memref<1x128xf32, #tpu.memory_space<vmem>>) target_semaphore(%42 : memref<!tpu.dma_semaphore, #tpu.memory_space<semaphore_mem>>)
    %c6_i32 = arith.constant 6 : i32
    %43 = arith.addi %0, %c6_i32 : i32
    %44 = arith.index_cast %43 : i32 to index
    %45 = memref.load %arg1[%44] : memref<24xi32, #tpu.memory_space<smem>>
    %c6_i32_24 = arith.constant 6 : i32
    %c0_i32_25 = arith.constant 0 : i32
    %46 = tpu.memref_slice %arg2[%45, %c0_i32_25] : memref<1000x128xf32, #tpu.memory_space<any>> -> memref<1x128xf32, #tpu.memory_space<any>>
    %c6_i32_26 = arith.constant 6 : i32
    %c0_i32_27 = arith.constant 0 : i32
    %47 = tpu.memref_slice %arg3[%c6_i32_26, %c0_i32_27] : memref<24x128xf32, #tpu.memory_space<vmem>> -> memref<1x128xf32, #tpu.memory_space<vmem>>
    %48 = tpu.memref_slice %arg4[%c6_i32_24] : memref<16x!tpu.dma_semaphore, #tpu.memory_space<semaphore_mem>> -> memref<1x!tpu.dma_semaphore, #tpu.memory_space<semaphore_mem>>
    %49 = tpu.memref_squeeze %48 : memref<1x!tpu.dma_semaphore, #tpu.memory_space<semaphore_mem>> -> memref<!tpu.dma_semaphore, #tpu.memory_space<semaphore_mem>>
    tpu.enqueue_dma source(%46 : memref<1x128xf32, #tpu.memory_space<any>>) target(%47 : memref<1x128xf32, #tpu.memory_space<vmem>>) target_semaphore(%49 : memref<!tpu.dma_semaphore, #tpu.memory_space<semaphore_mem>>)
    %c7_i32 = arith.constant 7 : i32
    %50 = arith.addi %0, %c7_i32 : i32
    %51 = arith.index_cast %50 : i32 to index
    %52 = memref.load %arg1[%51] : memref<24xi32, #tpu.memory_space<smem>>
    %c7_i32_28 = arith.constant 7 : i32
    %c0_i32_29 = arith.constant 0 : i32
    %53 = tpu.memref_slice %arg2[%52, %c0_i32_29] : memref<1000x128xf32, #tpu.memory_space<any>> -> memref<1x128xf32, #tpu.memory_space<any>>
    %c7_i32_30 = arith.constant 7 : i32
    %c0_i32_31 = arith.constant 0 : i32
    %54 = tpu.memref_slice %arg3[%c7_i32_30, %c0_i32_31] : memref<24x128xf32, #tpu.memory_space<vmem>> -> memref<1x128xf32, #tpu.memory_space<vmem>>
    %55 = tpu.memref_slice %arg4[%c7_i32_28] : memref<16x!tpu.dma_semaphore, #tpu.memory_space<semaphore_mem>> -> memref<1x!tpu.dma_semaphore, #tpu.memory_space<semaphore_mem>>
    %56 = tpu.memref_squeeze %55 : memref<1x!tpu.dma_semaphore, #tpu.memory_space<semaphore_mem>> -> memref<!tpu.dma_semaphore, #tpu.memory_space<semaphore_mem>>
    tpu.enqueue_dma source(%53 : memref<1x128xf32, #tpu.memory_space<any>>) target(%54 : memref<1x128xf32, #tpu.memory_space<vmem>>) target_semaphore(%56 : memref<!tpu.dma_semaphore, #tpu.memory_space<semaphore_mem>>)
    %c8_i32 = arith.constant 8 : i32
    %57 = arith.addi %0, %c8_i32 : i32
    %58 = arith.index_cast %57 : i32 to index
    %59 = memref.load %arg1[%58] : memref<24xi32, #tpu.memory_space<smem>>
    %c8_i32_32 = arith.constant 8 : i32
    %c0_i32_33 = arith.constant 0 : i32
    %60 = tpu.memref_slice %arg2[%59, %c0_i32_33] : memref<1000x128xf32, #tpu.memory_space<any>> -> memref<1x128xf32, #tpu.memory_space<any>>
    %c8_i32_34 = arith.constant 8 : i32
    %c0_i32_35 = arith.constant 0 : i32
    %61 = tpu.memref_slice %arg3[%c8_i32_34, %c0_i32_35] : memref<24x128xf32, #tpu.memory_space<vmem>> -> memref<1x128xf32, #tpu.memory_space<vmem>>
    %62 = tpu.memref_slice %arg4[%c8_i32_32] : memref<16x!tpu.dma_semaphore, #tpu.memory_space<semaphore_mem>> -> memref<1x!tpu.dma_semaphore, #tpu.memory_space<semaphore_mem>>
    %63 = tpu.memref_squeeze %62 : memref<1x!tpu.dma_semaphore, #tpu.memory_space<semaphore_mem>> -> memref<!tpu.dma_semaphore, #tpu.memory_space<semaphore_mem>>
    tpu.enqueue_dma source(%60 : memref<1x128xf32, #tpu.memory_space<any>>) target(%61 : memref<1x128xf32, #tpu.memory_space<vmem>>) target_semaphore(%63 : memref<!tpu.dma_semaphore, #tpu.memory_space<semaphore_mem>>)
    %c9_i32 = arith.constant 9 : i32
    %64 = arith.addi %0, %c9_i32 : i32
    %65 = arith.index_cast %64 : i32 to index
    %66 = memref.load %arg1[%65] : memref<24xi32, #tpu.memory_space<smem>>
    %c9_i32_36 = arith.constant 9 : i32
    %c0_i32_37 = arith.constant 0 : i32
    %67 = tpu.memref_slice %arg2[%66, %c0_i32_37] : memref<1000x128xf32, #tpu.memory_space<any>> -> memref<1x128xf32, #tpu.memory_space<any>>
    %c9_i32_38 = arith.constant 9 : i32
    %c0_i32_39 = arith.constant 0 : i32
    %68 = tpu.memref_slice %arg3[%c9_i32_38, %c0_i32_39] : memref<24x128xf32, #tpu.memory_space<vmem>> -> memref<1x128xf32, #tpu.memory_space<vmem>>
    %69 = tpu.memref_slice %arg4[%c9_i32_36] : memref<16x!tpu.dma_semaphore, #tpu.memory_space<semaphore_mem>> -> memref<1x!tpu.dma_semaphore, #tpu.memory_space<semaphore_mem>>
    %70 = tpu.memref_squeeze %69 : memref<1x!tpu.dma_semaphore, #tpu.memory_space<semaphore_mem>> -> memref<!tpu.dma_semaphore, #tpu.memory_space<semaphore_mem>>
    tpu.enqueue_dma source(%67 : memref<1x128xf32, #tpu.memory_space<any>>) target(%68 : memref<1x128xf32, #tpu.memory_space<vmem>>) target_semaphore(%70 : memref<!tpu.dma_semaphore, #tpu.memory_space<semaphore_mem>>)
    %c10_i32 = arith.constant 10 : i32
    %71 = arith.addi %0, %c10_i32 : i32
    %72 = arith.index_cast %71 : i32 to index
    %73 = memref.load %arg1[%72] : memref<24xi32, #tpu.memory_space<smem>>
    %c10_i32_40 = arith.constant 10 : i32
    %c0_i32_41 = arith.constant 0 : i32
    %74 = tpu.memref_slice %arg2[%73, %c0_i32_41] : memref<1000x128xf32, #tpu.memory_space<any>> -> memref<1x128xf32, #tpu.memory_space<any>>
    %c10_i32_42 = arith.constant 10 : i32
    %c0_i32_43 = arith.constant 0 : i32
    %75 = tpu.memref_slice %arg3[%c10_i32_42, %c0_i32_43] : memref<24x128xf32, #tpu.memory_space<vmem>> -> memref<1x128xf32, #tpu.memory_space<vmem>>
    %76 = tpu.memref_slice %arg4[%c10_i32_40] : memref<16x!tpu.dma_semaphore, #tpu.memory_space<semaphore_mem>> -> memref<1x!tpu.dma_semaphore, #tpu.memory_space<semaphore_mem>>
    %77 = tpu.memref_squeeze %76 : memref<1x!tpu.dma_semaphore, #tpu.memory_space<semaphore_mem>> -> memref<!tpu.dma_semaphore, #tpu.memory_space<semaphore_mem>>
    tpu.enqueue_dma source(%74 : memref<1x128xf32, #tpu.memory_space<any>>) target(%75 : memref<1x128xf32, #tpu.memory_space<vmem>>) target_semaphore(%77 : memref<!tpu.dma_semaphore, #tpu.memory_space<semaphore_mem>>)
    %c11_i32 = arith.constant 11 : i32
    %78 = arith.addi %0, %c11_i32 : i32
    %79 = arith.index_cast %78 : i32 to index
    %80 = memref.load %arg1[%79] : memref<24xi32, #tpu.memory_space<smem>>
    %c11_i32_44 = arith.constant 11 : i32
    %c0_i32_45 = arith.constant 0 : i32
    %81 = tpu.memref_slice %arg2[%80, %c0_i32_45] : memref<1000x128xf32, #tpu.memory_space<any>> -> memref<1x128xf32, #tpu.memory_space<any>>
    %c11_i32_46 = arith.constant 11 : i32
    %c0_i32_47 = arith.constant 0 : i32
    %82 = tpu.memref_slice %arg3[%c11_i32_46, %c0_i32_47] : memref<24x128xf32, #tpu.memory_space<vmem>> -> memref<1x128xf32, #tpu.memory_space<vmem>>
    %83 = tpu.memref_slice %arg4[%c11_i32_44] : memref<16x!tpu.dma_semaphore, #tpu.memory_space<semaphore_mem>> -> memref<1x!tpu.dma_semaphore, #tpu.memory_space<semaphore_mem>>
    %84 = tpu.memref_squeeze %83 : memref<1x!tpu.dma_semaphore, #tpu.memory_space<semaphore_mem>> -> memref<!tpu.dma_semaphore, #tpu.memory_space<semaphore_mem>>
    tpu.enqueue_dma source(%81 : memref<1x128xf32, #tpu.memory_space<any>>) target(%82 : memref<1x128xf32, #tpu.memory_space<vmem>>) target_semaphore(%84 : memref<!tpu.dma_semaphore, #tpu.memory_space<semaphore_mem>>)
    %c12_i32 = arith.constant 12 : i32
    %85 = arith.addi %0, %c12_i32 : i32
    %86 = arith.index_cast %85 : i32 to index
    %87 = memref.load %arg1[%86] : memref<24xi32, #tpu.memory_space<smem>>
    %c12_i32_48 = arith.constant 12 : i32
    %c0_i32_49 = arith.constant 0 : i32
    %88 = tpu.memref_slice %arg2[%87, %c0_i32_49] : memref<1000x128xf32, #tpu.memory_space<any>> -> memref<1x128xf32, #tpu.memory_space<any>>
    %c12_i32_50 = arith.constant 12 : i32
    %c0_i32_51 = arith.constant 0 : i32
    %89 = tpu.memref_slice %arg3[%c12_i32_50, %c0_i32_51] : memref<24x128xf32, #tpu.memory_space<vmem>> -> memref<1x128xf32, #tpu.memory_space<vmem>>
    %90 = tpu.memref_slice %arg4[%c12_i32_48] : memref<16x!tpu.dma_semaphore, #tpu.memory_space<semaphore_mem>> -> memref<1x!tpu.dma_semaphore, #tpu.memory_space<semaphore_mem>>
    %91 = tpu.memref_squeeze %90 : memref<1x!tpu.dma_semaphore, #tpu.memory_space<semaphore_mem>> -> memref<!tpu.dma_semaphore, #tpu.memory_space<semaphore_mem>>
    tpu.enqueue_dma source(%88 : memref<1x128xf32, #tpu.memory_space<any>>) target(%89 : memref<1x128xf32, #tpu.memory_space<vmem>>) target_semaphore(%91 : memref<!tpu.dma_semaphore, #tpu.memory_space<semaphore_mem>>)
    %c13_i32 = arith.constant 13 : i32
    %92 = arith.addi %0, %c13_i32 : i32
    %93 = arith.index_cast %92 : i32 to index
    %94 = memref.load %arg1[%93] : memref<24xi32, #tpu.memory_space<smem>>
    %c13_i32_52 = arith.constant 13 : i32
    %c0_i32_53 = arith.constant 0 : i32
    %95 = tpu.memref_slice %arg2[%94, %c0_i32_53] : memref<1000x128xf32, #tpu.memory_space<any>> -> memref<1x128xf32, #tpu.memory_space<any>>
    %c13_i32_54 = arith.constant 13 : i32
    %c0_i32_55 = arith.constant 0 : i32
    %96 = tpu.memref_slice %arg3[%c13_i32_54, %c0_i32_55] : memref<24x128xf32, #tpu.memory_space<vmem>> -> memref<1x128xf32, #tpu.memory_space<vmem>>
    %97 = tpu.memref_slice %arg4[%c13_i32_52] : memref<16x!tpu.dma_semaphore, #tpu.memory_space<semaphore_mem>> -> memref<1x!tpu.dma_semaphore, #tpu.memory_space<semaphore_mem>>
    %98 = tpu.memref_squeeze %97 : memref<1x!tpu.dma_semaphore, #tpu.memory_space<semaphore_mem>> -> memref<!tpu.dma_semaphore, #tpu.memory_space<semaphore_mem>>
    tpu.enqueue_dma source(%95 : memref<1x128xf32, #tpu.memory_space<any>>) target(%96 : memref<1x128xf32, #tpu.memory_space<vmem>>) target_semaphore(%98 : memref<!tpu.dma_semaphore, #tpu.memory_space<semaphore_mem>>)
    %c14_i32 = arith.constant 14 : i32
    %99 = arith.addi %0, %c14_i32 : i32
    %100 = arith.index_cast %99 : i32 to index
    %101 = memref.load %arg1[%100] : memref<24xi32, #tpu.memory_space<smem>>
    %c14_i32_56 = arith.constant 14 : i32
    %c0_i32_57 = arith.constant 0 : i32
    %102 = tpu.memref_slice %arg2[%101, %c0_i32_57] : memref<1000x128xf32, #tpu.memory_space<any>> -> memref<1x128xf32, #tpu.memory_space<any>>
    %c14_i32_58 = arith.constant 14 : i32
    %c0_i32_59 = arith.constant 0 : i32
    %103 = tpu.memref_slice %arg3[%c14_i32_58, %c0_i32_59] : memref<24x128xf32, #tpu.memory_space<vmem>> -> memref<1x128xf32, #tpu.memory_space<vmem>>
    %104 = tpu.memref_slice %arg4[%c14_i32_56] : memref<16x!tpu.dma_semaphore, #tpu.memory_space<semaphore_mem>> -> memref<1x!tpu.dma_semaphore, #tpu.memory_space<semaphore_mem>>
    %105 = tpu.memref_squeeze %104 : memref<1x!tpu.dma_semaphore, #tpu.memory_space<semaphore_mem>> -> memref<!tpu.dma_semaphore, #tpu.memory_space<semaphore_mem>>
    tpu.enqueue_dma source(%102 : memref<1x128xf32, #tpu.memory_space<any>>) target(%103 : memref<1x128xf32, #tpu.memory_space<vmem>>) target_semaphore(%105 : memref<!tpu.dma_semaphore, #tpu.memory_space<semaphore_mem>>)
    %c15_i32 = arith.constant 15 : i32
    %106 = arith.addi %0, %c15_i32 : i32
    %107 = arith.index_cast %106 : i32 to index
    %108 = memref.load %arg1[%107] : memref<24xi32, #tpu.memory_space<smem>>
    %c15_i32_60 = arith.constant 15 : i32
    %c0_i32_61 = arith.constant 0 : i32
    %109 = tpu.memref_slice %arg2[%108, %c0_i32_61] : memref<1000x128xf32, #tpu.memory_space<any>> -> memref<1x128xf32, #tpu.memory_space<any>>
    %c15_i32_62 = arith.constant 15 : i32
    %c0_i32_63 = arith.constant 0 : i32
    %110 = tpu.memref_slice %arg3[%c15_i32_62, %c0_i32_63] : memref<24x128xf32, #tpu.memory_space<vmem>> -> memref<1x128xf32, #tpu.memory_space<vmem>>
    %111 = tpu.memref_slice %arg4[%c15_i32_60] : memref<16x!tpu.dma_semaphore, #tpu.memory_space<semaphore_mem>> -> memref<1x!tpu.dma_semaphore, #tpu.memory_space<semaphore_mem>>
    %112 = tpu.memref_squeeze %111 : memref<1x!tpu.dma_semaphore, #tpu.memory_space<semaphore_mem>> -> memref<!tpu.dma_semaphore, #tpu.memory_space<semaphore_mem>>
    tpu.enqueue_dma source(%109 : memref<1x128xf32, #tpu.memory_space<any>>) target(%110 : memref<1x128xf32, #tpu.memory_space<vmem>>) target_semaphore(%112 : memref<!tpu.dma_semaphore, #tpu.memory_space<semaphore_mem>>)
    %c0_i32_64 = arith.constant 0 : i32
    %c24_i32_65 = arith.constant 24 : i32
    %113 = arith.addi %c0_i32_64, %c24_i32_65 : i32
    %c1_i32_66 = arith.constant 1 : i32
    scf.for %arg5 = %c0_i32_64 to %113 step %c1_i32_66  : i32 {
      %c1_i32_71 = arith.constant 1 : i32
      %118 = arith.muli %arg5, %c1_i32_71 : i32
      %c0_i32_72 = arith.constant 0 : i32
      %119 = arith.addi %c0_i32_72, %118 : i32
      %c15_i32_73 = arith.constant 15 : i32
      %120 = arith.andi %119, %c15_i32_73 : i32
      %c0_i32_74 = arith.constant 0 : i32
      %c0_i32_75 = arith.constant 0 : i32
      %121 = tpu.memref_slice %arg2[%c0_i32_74, %c0_i32_75] : memref<1000x128xf32, #tpu.memory_space<any>> -> memref<1x128xf32, #tpu.memory_space<any>>
      %c0_i32_76 = arith.constant 0 : i32
      %122 = tpu.memref_slice %arg3[%119, %c0_i32_76] : memref<24x128xf32, #tpu.memory_space<vmem>> -> memref<1x128xf32, #tpu.memory_space<vmem>>
      %123 = tpu.memref_slice %arg4[%120] : memref<16x!tpu.dma_semaphore, #tpu.memory_space<semaphore_mem>> -> memref<1x!tpu.dma_semaphore, #tpu.memory_space<semaphore_mem>>
      %124 = tpu.memref_squeeze %123 : memref<1x!tpu.dma_semaphore, #tpu.memory_space<semaphore_mem>> -> memref<!tpu.dma_semaphore, #tpu.memory_space<semaphore_mem>>
      tpu.wait_dma2 semaphore(%124 : memref<!tpu.dma_semaphore, #tpu.memory_space<semaphore_mem>>) src(%121 : memref<1x128xf32, #tpu.memory_space<any>>) dst(%122 : memref<1x128xf32, #tpu.memory_space<vmem>>)
      %c16_i32 = arith.constant 16 : i32
      %125 = arith.addi %119, %c16_i32 : i32
      %c24_i32_77 = arith.constant 24 : i32
      %126 = arith.cmpi slt, %125, %c24_i32_77 : i32
      %127 = arith.extui %126 : i1 to i32
      %c0_i32_78 = arith.constant 0 : i32
      %128 = arith.cmpi ne, %127, %c0_i32_78 : i32
      scf.if %128 {
        %c16_i32_79 = arith.constant 16 : i32
        %129 = arith.addi %119, %c16_i32_79 : i32
        %130 = arith.addi %0, %129 : i32
        %131 = arith.index_cast %130 : i32 to index
        %132 = memref.load %arg1[%131] : memref<24xi32, #tpu.memory_space<smem>>
        %c15_i32_80 = arith.constant 15 : i32
        %133 = arith.andi %129, %c15_i32_80 : i32
        %c0_i32_81 = arith.constant 0 : i32
        %134 = tpu.memref_slice %arg2[%132, %c0_i32_81] : memref<1000x128xf32, #tpu.memory_space<any>> -> memref<1x128xf32, #tpu.memory_space<any>>
        %c0_i32_82 = arith.constant 0 : i32
        %135 = tpu.memref_slice %arg3[%129, %c0_i32_82] : memref<24x128xf32, #tpu.memory_space<vmem>> -> memref<1x128xf32, #tpu.memory_space<vmem>>
        %136 = tpu.memref_slice %arg4[%133] : memref<16x!tpu.dma_semaphore, #tpu.memory_space<semaphore_mem>> -> memref<1x!tpu.dma_semaphore, #tpu.memory_space<semaphore_mem>>
        %137 = tpu.memref_squeeze %136 : memref<1x!tpu.dma_semaphore, #tpu.memory_space<semaphore_mem>> -> memref<!tpu.dma_semaphore, #tpu.memory_space<semaphore_mem>>
        tpu.enqueue_dma source(%134 : memref<1x128xf32, #tpu.memory_space<any>>) target(%135 : memref<1x128xf32, #tpu.memory_space<vmem>>) target_semaphore(%137 : memref<!tpu.dma_semaphore, #tpu.memory_space<semaphore_mem>>)
      } else {
      }
    }
    %c24_i32_67 = arith.constant 24 : i32
    %c0 = arith.constant 0 : index
    %c0_68 = arith.constant 0 : index
    %114 = vector.load %arg3[%c0, %c0_68] : memref<24x128xf32, #tpu.memory_space<vmem>>, vector<24x128xf32>
    %cst = arith.constant 11.3137083 : f32
    %115 = vector.broadcast %cst : f32 to vector<24x128xf32>
    %116 = arith.mulf %114, %115 : vector<24x128xf32>
    %c0_69 = arith.constant 0 : index
    %c0_70 = arith.constant 0 : index
    %117 = vector.load %arg3[%c0_69, %c0_70] : memref<24x128xf32, #tpu.memory_space<vmem>>, vector<24x128xf32>
    tpu.vector_store %arg3[%c0_69, %c0_70], %116 {strides = array<i32>} : memref<24x128xf32, #tpu.memory_space<vmem>>, vector<24x128xf32>,
    return
  }
  func.func @transform_1(%arg0: i32, %arg1: memref<24xi32, #tpu.memory_space<smem>>) -> (i32, i32) {
    %c0_i32 = arith.constant 0 : i32
    %c0_i32_0 = arith.constant 0 : i32
    return %arg0, %c0_i32 : i32, i32
  }
}

</mosaic_0001>

<bundles_post_ra>
// kernel: tpu_custom_call.1
= control target key start
LH: loop header
LB: loop body
LE: loop exit
PB: predicated region body
PF: predicated region fallthrough
CT: control target
= control target key end

     0   :  { %s996_s9 = smov [#allocation4]   ;;  %s1321_s0 = inlined_call_operand.hbm [shape: s32[24], index: 0, kind: input, shape index: {}]   ;;  %s1322_s1 = inlined_call_operand.hbm [shape: f32[1000,128], index: 1, kind: input, shape index: {}]   ;;  %s1323_s2 = inlined_call_operand.hbm [shape: f32[24,128], index: 2, kind: output, shape index: {}]  }
   0x1   :  { %8 = dma.hbm_to_smem %s1321_s0, 16, %s996_s9, [#allocation3] }
   0x2   :  { %986 = dma.done.wait [#allocation3], 16 }
   0x3   :  { %987 = vsyncadd [#allocation3], 4294967280 }
   0x4   :  { %10 = sfence }
   0x5   :  { %11 = vsyncpa [#allocation6], 0  ;;  %s13_s12 = sld [smem:[#allocation4]]  ;;  %s997_s13 = smov [#allocation5]  }
   0x6   :  { %s23_s14 = sshll.u32 %s997_s13, 4  ;;  %s1033_s15 = sld [smem:[#allocation4 + $0x1]]  ;;  %s1035_s14 = int_to_ptr.vmem [resolvable:$true] %s23_s14 }
   0x7   :  { %s998_s16 = smov [#allocation5 + $0x1]   ;;  %s1037_s18 = sld [smem:[#allocation4 + $0x2]] }
   0x8   :  { %s40_s17 = sshll.u32 %s998_s16, 4  ;;  %s999_s19 = smov [#allocation5 + $0x2]   ;;  %s1039_s17 = int_to_ptr.vmem [resolvable:$true] %s40_s17 }
   0x9   :  { %s57_s0 = sshll.u32 %s999_s19, 4  ;;  %s1041_s20 = sld [smem:[#allocation4 + $0x3]]  ;;  %s1043_s0 = int_to_ptr.vmem [resolvable:$true] %s57_s0 }
   0xa   :  { %s1052_s29 = scalar_lea.hbm %s1322_s1, 16000 }
   0xb   :  { %s495_s21 = sshll.u32 %s13_s12, 4 }
   0xc   :  { %s15_s24 = scalar_lea.hbm %s1322_s1, %s495_s21  ;;  %s497_s25 = sshll.u32 %s1033_s15, 4 }
   0xd   :  { %s584_s26 = scalar_lea.hbm %s15_s24, 16  ;;  %p587_p1 = scmp.lt.s32.totalorder %s15_s24, %s1322_s1 }
   0xe   :  { %p585_p0 = scmp.ne.s32.totalorder %s15_s24, %s584_s26  ;;  %p588_p2 = scmp.lt.s32.totalorder %s1052_s29, %s584_s26 }
  0x10   :  { %p589_p3 = por %p588_p2, %p587_p1 }
  0x12   :  { %p590_p4 = pnand %p589_p3, %p585_p0 }
  0x14   :  { %593 = shalt.err (!%p590_p4)  }
  0x15   :  { %s594_s4 = scalar_lea.vmem %s1035_s14, 16  ;;  %s1061_s5 = scalar_lea.vmem %s1035_s14, 384 }
  0x16   :  { %p595_p5 = scmp.ne.s32.totalorder %s1035_s14, %s594_s4  ;;  %p599_p6 = scmp.lt.s32.totalorder %s1035_s14, %s1035_s14 }
  0x17   :  { %p600_p7 = scmp.lt.s32.totalorder %s1061_s5, %s594_s4 }
  0x19   :  { %p601_p8 = por %p600_p7, %p599_p6 }
  0x1b   :  { %p602_p9 = pnand %p601_p8, %p595_p5 }
  0x1d   :  { %605 = shalt.err (!%p602_p9)  }
  0x1e   :  { %26 = dma.hbm_to_vmem [thread:$0]  %s15_s24, 16, %s1035_s14, [#allocation2] }
  0x1f   :  { %s30_s8 = scalar_lea.hbm %s1322_s1, %s497_s25  ;;  %s499_s9 = sshll.u32 %s1037_s18, 4 }
  0x20   :  { %s606_s10 = scalar_lea.hbm %s30_s8, 16  ;;  %p609_p11 = scmp.lt.s32.totalorder %s30_s8, %s1322_s1 }
  0x21   :  { %p607_p10 = scmp.ne.s32.totalorder %s30_s8, %s606_s10  ;;  %p610_p12 = scmp.lt.s32.totalorder %s1052_s29, %s606_s10 }
  0x23   :  { %p611_p13 = por %p610_p12, %p609_p11 }
  0x25   :  { %p612_p0 = pnand %p611_p13, %p607_p10 }
  0x27   :  { %615 = shalt.err (!%p612_p0)  }
  0x28   :  { %s616_s13 = scalar_lea.vmem %s1039_s17, 16  ;;  %p621_p2 = scmp.lt.s32.totalorder %s1039_s17, %s1035_s14 }
  0x29   :  { %p617_p1 = scmp.ne.s32.totalorder %s1039_s17, %s616_s13  ;;  %p622_p3 = scmp.lt.s32.totalorder %s1061_s5, %s616_s13 }
  0x2b   :  { %p623_p4 = por %p622_p3, %p621_p2 }
  0x2d   :  { %p624_p5 = pnand %p623_p4, %p617_p1 }
  0x2f   :  { %627 = shalt.err (!%p624_p5)  }
  0x30   :  { %43 = dma.hbm_to_vmem [thread:$0]  %s30_s8, 16, %s1039_s17, [#allocation2 + $0x1] }
  0x31   :  { %s47_s18 = scalar_lea.hbm %s1322_s1, %s499_s9  ;;  %s501_s19 = sshll.u32 %s1041_s20, 4 }
  0x32   :  { %s628_s21 = scalar_lea.hbm %s47_s18, 16  ;;  %p631_p8 = scmp.lt.s32.totalorder %s47_s18, %s1322_s1 }
  0x33   :  { %p629_p7 = scmp.ne.s32.totalorder %s47_s18, %s628_s21  ;;  %p632_p9 = scmp.lt.s32.totalorder %s1052_s29, %s628_s21 }
  0x35   :  { %p633_p10 = por %p632_p9, %p631_p8 }
  0x37   :  { %p634_p11 = pnand %p633_p10, %p629_p7 }
  0x39   :  { %637 = shalt.err (!%p634_p11)  }
  0x3a   :  { %s638_s17 = scalar_lea.vmem %s1043_s0, 16  ;;  %p643_p13 = scmp.lt.s32.totalorder %s1043_s0, %s1035_s14 }
  0x3b   :  { %p639_p12 = scmp.ne.s32.totalorder %s1043_s0, %s638_s17  ;;  %p644_p0 = scmp.lt.s32.totalorder %s1061_s5, %s638_s17 }
  0x3d   :  { %p645_p1 = por %p644_p0, %p643_p13 }
  0x3f   :  { %p646_p2 = pnand %p645_p1, %p639_p12 }
  0x41   :  { %649 = shalt.err (!%p646_p2)  }
  0x42   :  { %60 = dma.hbm_to_vmem [thread:$0]  %s47_s18, 16, %s1043_s0, [#allocation2 + $0x2] }
  0x43   :  { %s64_s25 = scalar_lea.hbm %s1322_s1, %s501_s19  ;;  %s1000_s26 = smov [#allocation5 + $0x3]  }
  0x44   :  { %s74_s27 = sshll.u32 %s1000_s26, 4  ;;  %s502_s28 = sld [smem:[#allocation4 + $0x4]]  ;;  %s75_s27 = int_to_ptr.vmem [resolvable:$true] %s74_s27 }
  0x45   :  { %s650_s30 = scalar_lea.hbm %s64_s25, 16  ;;  %p653_p4 = scmp.lt.s32.totalorder %s64_s25, %s1322_s1 }
  0x46   :  { %p651_p3 = scmp.ne.s32.totalorder %s64_s25, %s650_s30  ;;  %p654_p5 = scmp.lt.s32.totalorder %s1052_s29, %s650_s30 }
  0x48   :  { %p655_p7 = por %p654_p5, %p653_p4 }
  0x4a   :  { %p656_p8 = pnand %p655_p7, %p651_p3 }
  0x4c   :  { %659 = shalt.err (!%p656_p8)  }
  0x4d   :  { %s660_s6 = scalar_lea.vmem %s75_s27, 16  ;;  %p665_p10 = scmp.lt.s32.totalorder %s75_s27, %s1035_s14 }
  0x4e   :  { %p661_p9 = scmp.ne.s32.totalorder %s75_s27, %s660_s6  ;;  %p666_p11 = scmp.lt.s32.totalorder %s1061_s5, %s660_s6 }
  0x50   :  { %p667_p12 = por %p666_p11, %p665_p10 }
  0x52   :  { %p668_p13 = pnand %p667_p12, %p661_p9 }
  0x54   :  { %671 = shalt.err (!%p668_p13)  }
  0x55   :  { %77 = dma.hbm_to_vmem [thread:$0]  %s64_s25, 16, %s75_s27, [#allocation2 + $0x3] }
  0x56   :  { %s1001_s0 = smov [#allocation5 + $0x4]   ;;  %s504_s8 = sld [smem:[#allocation4 + $0x5]] }
  0x57   :  { %s91_s7 = sshll.u32 %s1001_s0, 4  ;;  %s1002_s9 = smov [#allocation5 + $0x5]   ;;  %s92_s7 = int_to_ptr.vmem [resolvable:$true] %s91_s7 }
  0x58   :  { %s108_s10 = sshll.u32 %s1002_s9, 4  ;;  %s1107_s11 = sld [smem:[#allocation4 + $0x6]]  ;;  %s1109_s10 = int_to_ptr.vmem [resolvable:$true] %s108_s10 }
  0x59   :  { %s503_s12 = sshll.u32 %s502_s28, 4 }
  0x5a   :  { %s81_s16 = scalar_lea.hbm %s1322_s1, %s503_s12 }
  0x5b   :  { %s672_s18 = scalar_lea.hbm %s81_s16, 16  ;;  %p675_p1 = scmp.lt.s32.totalorder %s81_s16, %s1322_s1 }
  0x5c   :  { %p673_p0 = scmp.ne.s32.totalorder %s81_s16, %s672_s18  ;;  %p676_p2 = scmp.lt.s32.totalorder %s1052_s29, %s672_s18 }
  0x5e   :  { %p677_p3 = por %p676_p2, %p675_p1 }
  0x60   :  { %p678_p4 = pnand %p677_p3, %p673_p0 }
  0x62   :  { %681 = shalt.err (!%p678_p4)  }
  0x63   :  { %s682_s22 = scalar_lea.vmem %s92_s7, 16  ;;  %p687_p7 = scmp.lt.s32.totalorder %s92_s7, %s1035_s14 }
  0x64   :  { %p683_p5 = scmp.ne.s32.totalorder %s92_s7, %s682_s22  ;;  %p688_p8 = scmp.lt.s32.totalorder %s1061_s5, %s682_s22 }
  0x66   :  { %p689_p9 = por %p688_p8, %p687_p7 }
  0x68   :  { %p690_p10 = pnand %p689_p9, %p683_p5 }
  0x6a   :  { %693 = shalt.err (!%p690_p10)  }
  0x6b   :  { %94 = dma.hbm_to_vmem [thread:$0]  %s81_s16, 16, %s92_s7, [#allocation2 + $0x4] }
  0x6c   :  { %s505_s23 = sshll.u32 %s504_s8, 4  ;;  %s1003_s17 = smov [#allocation5 + $0x6]  }
  0x6d   :  { %s125_s20 = sshll.u32 %s1003_s17, 4  ;;  %s98_s26 = scalar_lea.hbm %s1322_s1, %s505_s23  ;;  %s1123_s20 = int_to_ptr.vmem [resolvable:$true] %s125_s20 }
  0x6e   :  { %s694_s27 = scalar_lea.hbm %s98_s26, 16  ;;  %p697_p12 = scmp.lt.s32.totalorder %s98_s26, %s1322_s1 }
  0x6f   :  { %p695_p11 = scmp.ne.s32.totalorder %s98_s26, %s694_s27  ;;  %p698_p13 = scmp.lt.s32.totalorder %s1052_s29, %s694_s27 }
  0x71   :  { %p699_p0 = por %p698_p13, %p697_p12 }
  0x73   :  { %p700_p1 = pnand %p699_p0, %p695_p11 }
  0x75   :  { %703 = shalt.err (!%p700_p1)  }
  0x76   :  { %s704_s3 = scalar_lea.vmem %s1109_s10, 16  ;;  %p709_p3 = scmp.lt.s32.totalorder %s1109_s10, %s1035_s14 }
  0x77   :  { %p705_p2 = scmp.ne.s32.totalorder %s1109_s10, %s704_s3  ;;  %p710_p4 = scmp.lt.s32.totalorder %s1061_s5, %s704_s3 }
  0x79   :  { %p711_p5 = por %p710_p4, %p709_p3 }
  0x7b   :  { %p712_p7 = pnand %p711_p5, %p705_p2 }
  0x7d   :  { %715 = shalt.err (!%p712_p7)  }
  0x7e   :  { %111 = dma.hbm_to_vmem [thread:$0]  %s98_s26, 16, %s1109_s10, [#allocation2 + $0x5] }
  0x7f   :  { %s507_s4 = sshll.u32 %s1107_s11, 4  ;;  %s508_s6 = sld [smem:[#allocation4 + $0x7]] }
  0x80   :  { %s115_s8 = scalar_lea.hbm %s1322_s1, %s507_s4 }
  0x81   :  { %s716_s9 = scalar_lea.hbm %s115_s8, 16  ;;  %p719_p9 = scmp.lt.s32.totalorder %s115_s8, %s1322_s1 }
  0x82   :  { %p717_p8 = scmp.ne.s32.totalorder %s115_s8, %s716_s9  ;;  %p720_p10 = scmp.lt.s32.totalorder %s1052_s29, %s716_s9 }
  0x84   :  { %p721_p11 = por %p720_p10, %p719_p9 }
  0x86   :  { %p722_p12 = pnand %p721_p11, %p717_p8 }
  0x88   :  { %725 = shalt.err (!%p722_p12)  }
  0x89   :  { %s726_s10 = scalar_lea.vmem %s1123_s20, 16  ;;  %p731_p0 = scmp.lt.s32.totalorder %s1123_s20, %s1035_s14 }
  0x8a   :  { %p727_p13 = scmp.ne.s32.totalorder %s1123_s20, %s726_s10  ;;  %p732_p1 = scmp.lt.s32.totalorder %s1061_s5, %s726_s10 }
  0x8c   :  { %p733_p2 = por %p732_p1, %p731_p0 }
  0x8e   :  { %p734_p3 = pnand %p733_p2, %p727_p13 }
  0x90   :  { %737 = shalt.err (!%p734_p3)  }
  0x91   :  { %128 = dma.hbm_to_vmem [thread:$0]  %s115_s8, 16, %s1123_s20, [#allocation2 + $0x6] }
  0x92   :  { %s1004_s11 = smov [#allocation5 + $0x7]   ;;  %s510_s16 = sld [smem:[#allocation4 + $0x8]] }
  0x93   :  { %s142_s15 = sshll.u32 %s1004_s11, 4  ;;  %s1005_s18 = smov [#allocation5 + $0x8]   ;;  %s143_s15 = int_to_ptr.vmem [resolvable:$true] %s142_s15 }
  0x94   :  { %s159_s19 = sshll.u32 %s1005_s18, 4  ;;  %s1149_s21 = sld [smem:[#allocation4 + $0x9]]  ;;  %s1151_s19 = int_to_ptr.vmem [resolvable:$true] %s159_s19 }
  0x95   :  { %s509_s22 = sshll.u32 %s508_s6, 4 }
  0x96   :  { %s132_s24 = scalar_lea.hbm %s1322_s1, %s509_s22 }
  0x97   :  { %s738_s25 = scalar_lea.hbm %s132_s24, 16  ;;  %p741_p5 = scmp.lt.s32.totalorder %s132_s24, %s1322_s1 }
  0x98   :  { %p739_p4 = scmp.ne.s32.totalorder %s132_s24, %s738_s25  ;;  %p742_p7 = scmp.lt.s32.totalorder %s1052_s29, %s738_s25 }
  0x9a   :  { %p743_p8 = por %p742_p7, %p741_p5 }
  0x9c   :  { %p744_p9 = pnand %p743_p8, %p739_p4 }
  0x9e   :  { %747 = shalt.err (!%p744_p9)  }
  0x9f   :  { %s748_s20 = scalar_lea.vmem %s143_s15, 16  ;;  %p753_p11 = scmp.lt.s32.totalorder %s143_s15, %s1035_s14 }
  0xa0   :  { %p749_p10 = scmp.ne.s32.totalorder %s143_s15, %s748_s20  ;;  %p754_p12 = scmp.lt.s32.totalorder %s1061_s5, %s748_s20 }
  0xa2   :  { %p755_p13 = por %p754_p12, %p753_p11 }
  0xa4   :  { %p756_p0 = pnand %p755_p13, %p749_p10 }
  0xa6   :  { %759 = shalt.err (!%p756_p0)  }
  0xa7   :  { %145 = dma.hbm_to_vmem [thread:$0]  %s132_s24, 16, %s143_s15, [#allocation2 + $0x7] }
  0xa8   :  { %s511_s28 = sshll.u32 %s510_s16, 4  ;;  %s1006_s30 = smov [#allocation5 + $0x9]  }
  0xa9   :  { %s176_s3 = sshll.u32 %s1006_s30, 4  ;;  %s149_s0 = scalar_lea.hbm %s1322_s1, %s511_s28  ;;  %s1165_s3 = int_to_ptr.vmem [resolvable:$true] %s176_s3 }
  0xaa   :  { %s760_s7 = scalar_lea.hbm %s149_s0, 16  ;;  %p763_p2 = scmp.lt.s32.totalorder %s149_s0, %s1322_s1 }
  0xab   :  { %p761_p1 = scmp.ne.s32.totalorder %s149_s0, %s760_s7  ;;  %p764_p3 = scmp.lt.s32.totalorder %s1052_s29, %s760_s7 }
  0xad   :  { %p765_p4 = por %p764_p3, %p763_p2 }
  0xaf   :  { %p766_p5 = pnand %p765_p4, %p761_p1 }
  0xb1   :  { %769 = shalt.err (!%p766_p5)  }
  0xb2   :  { %s770_s12 = scalar_lea.vmem %s1151_s19, 16  ;;  %p775_p8 = scmp.lt.s32.totalorder %s1151_s19, %s1035_s14 }
  0xb3   :  { %p771_p7 = scmp.ne.s32.totalorder %s1151_s19, %s770_s12  ;;  %p776_p9 = scmp.lt.s32.totalorder %s1061_s5, %s770_s12 }
  0xb5   :  { %p777_p10 = por %p776_p9, %p775_p8 }
  0xb7   :  { %p778_p11 = pnand %p777_p10, %p771_p7 }
  0xb9   :  { %781 = shalt.err (!%p778_p11)  }
  0xba   :  { %162 = dma.hbm_to_vmem [thread:$0]  %s149_s0, 16, %s1151_s19, [#allocation2 + $0x8] }
  0xbb   :  { %s513_s13 = sshll.u32 %s1149_s21, 4  ;;  %s514_s10 = sld [smem:[#allocation4 + $0xa]] }
  0xbc   :  { %s166_s16 = scalar_lea.hbm %s1322_s1, %s513_s13 }
  0xbd   :  { %s782_s18 = scalar_lea.hbm %s166_s16, 16  ;;  %p785_p13 = scmp.lt.s32.totalorder %s166_s16, %s1322_s1 }
  0xbe   :  { %p783_p12 = scmp.ne.s32.totalorder %s166_s16, %s782_s18  ;;  %p786_p0 = scmp.lt.s32.totalorder %s1052_s29, %s782_s18 }
  0xc0   :  { %p787_p1 = por %p786_p0, %p785_p13 }
  0xc2   :  { %p788_p2 = pnand %p787_p1, %p783_p12 }
  0xc4   :  { %791 = shalt.err (!%p788_p2)  }
  0xc5   :  { %s792_s19 = scalar_lea.vmem %s1165_s3, 16  ;;  %p797_p4 = scmp.lt.s32.totalorder %s1165_s3, %s1035_s14 }
  0xc6   :  { %p793_p3 = scmp.ne.s32.totalorder %s1165_s3, %s792_s19  ;;  %p798_p5 = scmp.lt.s32.totalorder %s1061_s5, %s792_s19 }
  0xc8   :  { %p799_p7 = por %p798_p5, %p797_p4 }
  0xca   :  { %p800_p8 = pnand %p799_p7, %p793_p3 }
  0xcc   :  { %803 = shalt.err (!%p800_p8)  }
  0xcd   :  { %179 = dma.hbm_to_vmem [thread:$0]  %s166_s16, 16, %s1165_s3, [#allocation2 + $0x9] }
  0xce   :  { %s1007_s21 = smov [#allocation5 + $0xa]   ;;  %s516_s24 = sld [smem:[#allocation4 + $0xb]] }
  0xcf   :  { %s193_s17 = sshll.u32 %s1007_s21, 4  ;;  %s1008_s25 = smov [#allocation5 + $0xb]   ;;  %s194_s17 = int_to_ptr.vmem [resolvable:$true] %s193_s17 }
  0xd0   :  { %s210_s26 = sshll.u32 %s1008_s25, 4  ;;  %s1191_s27 = sld [smem:[#allocation4 + $0xc]]  ;;  %s1193_s26 = int_to_ptr.vmem [resolvable:$true] %s210_s26 }
  0xd1   :  { %s515_s20 = sshll.u32 %s514_s10, 4 }
  0xd2   :  { %s183_s4 = scalar_lea.hbm %s1322_s1, %s515_s20 }
  0xd3   :  { %s804_s6 = scalar_lea.hbm %s183_s4, 16  ;;  %p807_p10 = scmp.lt.s32.totalorder %s183_s4, %s1322_s1 }
  0xd4   :  { %p805_p9 = scmp.ne.s32.totalorder %s183_s4, %s804_s6  ;;  %p808_p11 = scmp.lt.s32.totalorder %s1052_s29, %s804_s6 }
  0xd6   :  { %p809_p12 = por %p808_p11, %p807_p10 }
  0xd8   :  { %p810_p13 = pnand %p809_p12, %p805_p9 }
  0xda   :  { %813 = shalt.err (!%p810_p13)  }
  0xdb   :  { %s814_s3 = scalar_lea.vmem %s194_s17, 16  ;;  %p819_p1 = scmp.lt.s32.totalorder %s194_s17, %s1035_s14 }
  0xdc   :  { %p815_p0 = scmp.ne.s32.totalorder %s194_s17, %s814_s3  ;;  %p820_p2 = scmp.lt.s32.totalorder %s1061_s5, %s814_s3 }
  0xde   :  { %p821_p3 = por %p820_p2, %p819_p1 }
  0xe0   :  { %p822_p4 = pnand %p821_p3, %p815_p0 }
  0xe2   :  { %825 = shalt.err (!%p822_p4)  }
  0xe3   :  { %196 = dma.hbm_to_vmem [thread:$0]  %s183_s4, 16, %s194_s17, [#allocation2 + $0xa] }
  0xe4   :  { %s517_s8 = sshll.u32 %s516_s24, 4  ;;  %s1009_s9 = smov [#allocation5 + $0xc]  }
  0xe5   :  { %s227_s12 = sshll.u32 %s1009_s9, 4  ;;  %s200_s11 = scalar_lea.hbm %s1322_s1, %s517_s8  ;;  %s1207_s12 = int_to_ptr.vmem [resolvable:$true] %s227_s12 }
  0xe6   :  { %s826_s15 = scalar_lea.hbm %s200_s11, 16  ;;  %p829_p7 = scmp.lt.s32.totalorder %s200_s11, %s1322_s1 }
  0xe7   :  { %p827_p5 = scmp.ne.s32.totalorder %s200_s11, %s826_s15  ;;  %p830_p8 = scmp.lt.s32.totalorder %s1052_s29, %s826_s15 }
  0xe9   :  { %p831_p9 = por %p830_p8, %p829_p7 }
  0xeb   :  { %p832_p10 = pnand %p831_p9, %p827_p5 }
  0xed   :  { %835 = shalt.err (!%p832_p10)  }
  0xee   :  { %s836_s22 = scalar_lea.vmem %s1193_s26, 16  ;;  %p841_p12 = scmp.lt.s32.totalorder %s1193_s26, %s1035_s14 }
  0xef   :  { %p837_p11 = scmp.ne.s32.totalorder %s1193_s26, %s836_s22  ;;  %p842_p13 = scmp.lt.s32.totalorder %s1061_s5, %s836_s22 }
  0xf1   :  { %p843_p0 = por %p842_p13, %p841_p12 }
  0xf3   :  { %p844_p1 = pnand %p843_p0, %p837_p11 }
  0xf5   :  { %847 = shalt.err (!%p844_p1)  }
  0xf6   :  { %213 = dma.hbm_to_vmem [thread:$0]  %s200_s11, 16, %s1193_s26, [#allocation2 + $0xb] }
  0xf7   :  { %s519_s23 = sshll.u32 %s1191_s27, 4  ;;  %s520_s19 = sld [smem:[#allocation4 + $0xd]] }
  0xf8   :  { %s217_s24 = scalar_lea.hbm %s1322_s1, %s519_s23 }
  0xf9   :  { %s848_s25 = scalar_lea.hbm %s217_s24, 16  ;;  %p851_p3 = scmp.lt.s32.totalorder %s217_s24, %s1322_s1 }
  0xfa   :  { %p849_p2 = scmp.ne.s32.totalorder %s217_s24, %s848_s25  ;;  %p852_p4 = scmp.lt.s32.totalorder %s1052_s29, %s848_s25 }
  0xfc   :  { %p853_p5 = por %p852_p4, %p851_p3 }
  0xfe   :  { %p854_p7 = pnand %p853_p5, %p849_p2 }
 0x100   :  { %857 = shalt.err (!%p854_p7)  }
 0x101   :  { %s858_s26 = scalar_lea.vmem %s1207_s12, 16  ;;  %p863_p9 = scmp.lt.s32.totalorder %s1207_s12, %s1035_s14 }
 0x102   :  { %p859_p8 = scmp.ne.s32.totalorder %s1207_s12, %s858_s26  ;;  %p864_p10 = scmp.lt.s32.totalorder %s1061_s5, %s858_s26 }
 0x104   :  { %p865_p11 = por %p864_p10, %p863_p9 }
 0x106   :  { %p866_p12 = pnand %p865_p11, %p859_p8 }
 0x108   :  { %869 = shalt.err (!%p866_p12)  }
 0x109   :  { %230 = dma.hbm_to_vmem [thread:$0]  %s217_s24, 16, %s1207_s12, [#allocation2 + $0xc] }
 0x10a   :  { %s1010_s27 = smov [#allocation5 + $0xd]   ;;  %s522_s4 = sld [smem:[#allocation4 + $0xe]] }
 0x10b   :  { %s244_s30 = sshll.u32 %s1010_s27, 4  ;;  %s1011_s6 = smov [#allocation5 + $0xe]   ;;  %s245_s30 = int_to_ptr.vmem [resolvable:$true] %s244_s30 }
 0x10c   :  { %s261_s0 = sshll.u32 %s1011_s6, 4  ;;  %s1233_s7 = sld [smem:[#allocation4 + $0xf]]  ;;  %s1235_s0 = int_to_ptr.vmem [resolvable:$true] %s261_s0 }
 0x10d   :  { %s521_s3 = sshll.u32 %s520_s19, 4 }
 0x10e   :  { %s234_s13 = scalar_lea.hbm %s1322_s1, %s521_s3 }
 0x10f   :  { %s870_s10 = scalar_lea.hbm %s234_s13, 16  ;;  %p873_p0 = scmp.lt.s32.totalorder %s234_s13, %s1322_s1 }
 0x110   :  { %p871_p13 = scmp.ne.s32.totalorder %s234_s13, %s870_s10  ;;  %p874_p1 = scmp.lt.s32.totalorder %s1052_s29, %s870_s10 }
 0x112   :  { %p875_p2 = por %p874_p1, %p873_p0 }
 0x114   :  { %p876_p3 = pnand %p875_p2, %p871_p13 }
 0x116   :  { %879 = shalt.err (!%p876_p3)  }
 0x117   :  { %s880_s12 = scalar_lea.vmem %s245_s30, 16  ;;  %p885_p5 = scmp.lt.s32.totalorder %s245_s30, %s1035_s14 }
 0x118   :  { %p881_p4 = scmp.ne.s32.totalorder %s245_s30, %s880_s12  ;;  %p886_p7 = scmp.lt.s32.totalorder %s1061_s5, %s880_s12 }
 0x11a   :  { %p887_p8 = por %p886_p7, %p885_p5 }
 0x11c   :  { %p888_p9 = pnand %p887_p8, %p881_p4 }
 0x11e   :  { %891 = shalt.err (!%p888_p9)  }
 0x11f   :  { %247 = dma.hbm_to_vmem [thread:$0]  %s234_s13, 16, %s245_s30, [#allocation2 + $0xd] }
 0x120   :  { %s523_s16 = sshll.u32 %s522_s4, 4  ;;  %s1012_s18 = smov [#allocation5 + $0xf]  }
 0x121   :  { %s278_s22 = sshll.u32 %s1012_s18, 4  ;;  %s251_s21 = scalar_lea.hbm %s1322_s1, %s523_s16  ;;  %s1249_s22 = int_to_ptr.vmem [resolvable:$true] %s278_s22 }
 0x122   :  { %s892_s17 = scalar_lea.hbm %s251_s21, 16  ;;  %p895_p11 = scmp.lt.s32.totalorder %s251_s21, %s1322_s1 }
 0x123   :  { %p893_p10 = scmp.ne.s32.totalorder %s251_s21, %s892_s17  ;;  %p896_p12 = scmp.lt.s32.totalorder %s1052_s29, %s892_s17 }
 0x125   :  { %p897_p13 = por %p896_p12, %p895_p11 }
 0x127   :  { %p898_p0 = pnand %p897_p13, %p893_p10 }
 0x129   :  { %901 = shalt.err (!%p898_p0)  }
 0x12a   :  { %s902_s20 = scalar_lea.vmem %s1235_s0, 16  ;;  %p907_p2 = scmp.lt.s32.totalorder %s1235_s0, %s1035_s14 }
 0x12b   :  { %p903_p1 = scmp.ne.s32.totalorder %s1235_s0, %s902_s20  ;;  %p908_p3 = scmp.lt.s32.totalorder %s1061_s5, %s902_s20 }
 0x12d   :  { %p909_p4 = por %p908_p3, %p907_p2 }
 0x12f   :  { %p910_p5 = pnand %p909_p4, %p903_p1 }
 0x131   :  { %913 = shalt.err (!%p910_p5)  }
 0x132   :  { %264 = dma.hbm_to_vmem [thread:$0]  %s251_s21, 16, %s1235_s0, [#allocation2 + $0xe] }
 0x133   :  { %s525_s28 = sshll.u32 %s1233_s7, 4 }
 0x134   :  { %s268_s30 = scalar_lea.hbm %s1322_s1, %s525_s28 }
 0x135   :  { %s914_s4 = scalar_lea.hbm %s268_s30, 16  ;;  %p917_p8 = scmp.lt.s32.totalorder %s268_s30, %s1322_s1 }
 0x136   :  { %p915_p7 = scmp.ne.s32.totalorder %s268_s30, %s914_s4  ;;  %p918_p9 = scmp.lt.s32.totalorder %s1052_s29, %s914_s4 }
 0x138   :  { %p919_p10 = por %p918_p9, %p917_p8 }
 0x13a   :  { %p920_p11 = pnand %p919_p10, %p915_p7 }
 0x13c   :  { %923 = shalt.err (!%p920_p11)  }
 0x13d   :  { %s924_s0 = scalar_lea.vmem %s1249_s22, 16  ;;  %p929_p13 = scmp.lt.s32.totalorder %s1249_s22, %s1035_s14 }
 0x13e   :  { %p925_p12 = scmp.ne.s32.totalorder %s1249_s22, %s924_s0  ;;  %p930_p0 = scmp.lt.s32.totalorder %s1061_s5, %s924_s0 }
 0x140   :  { %p931_p1 = por %p930_p0, %p929_p13 }
 0x142   :  { %p932_p2 = pnand %p931_p1, %p925_p12 }
 0x144   :  { %935 = shalt.err (!%p932_p2)  }
 0x145   :  { %281 = dma.hbm_to_vmem [thread:$0]  %s268_s30, 16, %s1249_s22, [#allocation2 + $0xf] }
 0x146   :  { %s1275_s7 = smov 0  }
 0x147 LB: > { %s288_s8 = sand.u32 15, %s994_s7  ;;  %s994_s7 = sphi %s1275_s7, %s287_s7  }
 0x148   : > { %s289_s9 = scalar_lea.sflag [#allocation2], %s288_s8 }
 0x149   : > { %988 = dma.done.wait %s289_s9, 16 }
 0x14a   : > { %989 = vsyncadd %s289_s9, 4294967280  ;;  %s1282_s13 = sadd.s32 16, %s994_s7  ;;  %s487_s15 = scalar_lea.vmem [#allocation5], %s994_s7 }
 0x14b   : > { %p548_p3 = scmp.lt.s32.totalorder %s1282_s13, 24  ;;  %s488_s12 = scalar_lea.vmem %s487_s15, 16 [#allocation5] }
 0x14c   : > { %s300_s18 = sand.u32 15, %s1282_s13  ;;  %s312_s22 = sshll.u32 %s488_s12, 4  ;;  %s313_s22 = int_to_ptr.vmem [resolvable:$true] %s312_s22 }
 0x14d   : > { %s545_s10 = scalar_select %p548_p3, [#allocation4], [#allocation43] }
 0x14e   : > { %s546_s11 = scalar_select %p548_p3, %s1282_s13, 0 }
 0x14f   : > { %s304_s24 = scalar_lea.sflag [#allocation2], %s300_s18 }
 0x150   : > { %s299_s16 = sld [smem:[%s545_s10 + %s546_s11]] }
 0x156   : > { %s527_s23 = sshll.u32 %s299_s16, 4 }
 0x157   : > { %s302_s17 = scalar_lea.hbm %s1322_s1, %s527_s23 }
 0x158   : > { %s936_s25 = scalar_lea.hbm %s302_s17, 16  ;;  %p941_p8 = scmp.lt.s32.totalorder %s302_s17, %s1322_s1 }
 0x159   : > { %p937_p4 = scmp.ne.s32.totalorder %s302_s17, %s936_s25  ;;  %p942_p9 = scmp.lt.s32.totalorder %s1052_s29, %s936_s25 }
 0x15b   : > { %p938_p5 = pnand %p937_p4, %p548_p3  ;;  %p943_p10 = por %p942_p9, %p941_p8 }
 0x15d   : > { %p939_p7 = pneg %p938_p5 }
 0x15f   : > { %p944_p11 = pnand %p943_p10, %p939_p7 }
 0x161   : > { %947 = shalt.err (!%p944_p11)  }
 0x162   : > { %s948_s26 = scalar_lea.vmem %s313_s22, 16  ;;  %p955_p1 = scmp.lt.s32.totalorder %s313_s22, %s1035_s14 }
 0x163   : > { %p949_p12 = scmp.ne.s32.totalorder %s313_s22, %s948_s26  ;;  %p956_p2 = scmp.lt.s32.totalorder %s1061_s5, %s948_s26 }
 0x165   : > { %p950_p13 = pnand %p949_p12, %p548_p3  ;;  %p957_p4 = por %p956_p2, %p955_p1 }
 0x167   : > { %p951_p0 = pneg %p950_p13 }
 0x169   : > { %p958_p5 = pnand %p957_p4, %p951_p0 }
 0x16b   : > { %961 = shalt.err (!%p958_p5)  }
 0x16c   : > { %547 = dma.hbm_to_vmem [thread:$0]  (%p548_p3), %s302_s17, 16, %s313_s22, %s304_s24 }
 0x16d   : > { %s287_s7 = sadd.s32 1, %s994_s7  }
 0x16e   : > { %p284_p7 = scmp.ge.s32.totalorder %s287_s7, 24  }
 0x16f   :  { %v316_v0 = vld [vmem:[#allocation5] sm:$0xff] (%p284_p7)  ;;  %v317_v1 = vld [vmem:[#allocation5 + $0x8] sm:$0xff] (%p284_p7)  ;;  %v318_v2 = vld [vmem:[#allocation5 + $0x10] sm:$0xff] (%p284_p7)  ;;  %p963_p3 = scmp.ne.s32.totalorder (%p284_p7), %s1035_s14, %s1061_s5  ;;  %p968_p8 = scmp.lt.s32.totalorder (%p284_p7), %s1061_s5, %s1061_s5 }
 0x170   :  { %286 = sbr.rel (!%p284_p7) target bundleno = 327 (0x147), region = 164  ;;  %v319_v3 = vmul.f32 (%p284_p7), 11.313708, %v316_v0  ;;  %v320_v4 = vmul.f32 (%p284_p7), 11.313708, %v317_v1 }
 0x171   :  { %v321_v5 = vmul.f32 (%p284_p7), 11.313708, %v318_v2  ;;  %p969_p9 = por (%p284_p7), %p968_p8, %p599_p6 }
 0x172   :  { %322 = vst [vmem:[#allocation5] sm:$0xff] (%p284_p7), %v319_v3  ;;  %323 = vst [vmem:[#allocation5 + $0x8] sm:$0xff] (%p284_p7), %v320_v4 }
 0x173   :  { %324 = vst [vmem:[#allocation5 + $0x10] sm:$0xff] (%p284_p7), %v321_v5  ;;  %p970_p10 = pnand (%p284_p7), %p969_p9, %p963_p3 }
 0x175   :  { %973 = shalt.err (!%p970_p10)
}
 0x176   :  { %s1013_s1 = smov 128   ;;  %s1014_s29 = smov 8  }
 0x177   :  { %336 = dma.vmem_to_hbm [thread:$0]  %s1035_s14, 384, %s1323_s2, [#allocation6], %s1013_s1, %s1013_s1, %s1014_s29  }
 0x178   :  { %990 = dma.done.wait [#allocation6], 384  }
 0x179   :  { %991 = vsyncadd [#allocation6], 4294966912 }
 0x17a   :  { %340 = vsyncpa [#allocation6], 1 }
 0x17b   :  { %341 = vsyncmov [#allocation2] }
 0x17e   :  { %s342_s4 = vpop.sfrf %341 }
 0x17f   :  { %p528_p11 = scmp.ne.s32.totalorder %s342_s4, 0 }
 0x181   :  { %346 = shalt.err (%p528_p11)  }
 0x182   :  { %348 = vsyncmov [#allocation2 + $0x1] }
 0x185   :  { %s349_s5 = vpop.sfrf %348 }
 0x186   :  { %p529_p12 = scmp.ne.s32.totalorder %s349_s5, 0 }
 0x188   :  { %353 = shalt.err (%p529_p12)  }
 0x189   :  { %355 = vsyncmov [#allocation2 + $0x2] }
 0x18c   :  { %s356_s6 = vpop.sfrf %355 }
 0x18d   :  { %p530_p6 = scmp.ne.s32.totalorder %s356_s6, 0 }
 0x18f   :  { %360 = shalt.err (%p530_p6)  }
 0x190   :  { %362 = vsyncmov [#allocation2 + $0x3] }
 0x193   :  { %s363_s3 = vpop.sfrf %362 }
 0x194   :  { %p531_p13 = scmp.ne.s32.totalorder %s363_s3, 0 }
 0x196   :  { %367 = shalt.err (%p531_p13)  }
 0x197   :  { %369 = vsyncmov [#allocation2 + $0x4] }
 0x19a   :  { %s370_s2 = vpop.sfrf %369 }
 0x19b   :  { %p532_p0 = scmp.ne.s32.totalorder %s370_s2, 0 }
 0x19d   :  { %374 = shalt.err (%p532_p0)  }
 0x19e   :  { %376 = vsyncmov [#allocation2 + $0x5] }
 0x1a1   :  { %s377_s14 = vpop.sfrf %376 }
 0x1a2   :  { %p533_p1 = scmp.ne.s32.totalorder %s377_s14, 0 }
 0x1a4   :  { %381 = shalt.err (%p533_p1)  }
 0x1a5   :  { %383 = vsyncmov [#allocation2 + $0x6] }
 0x1a8   :  { %s384_s0 = vpop.sfrf %383 }
 0x1a9   :  { %p534_p2 = scmp.ne.s32.totalorder %s384_s0, 0 }
 0x1ab   :  { %388 = shalt.err (%p534_p2)  }
 0x1ac   :  { %390 = vsyncmov [#allocation2 + $0x7] }
 0x1af   :  { %s391_s7 = vpop.sfrf %390 }
 0x1b0   :  { %p535_p4 = scmp.ne.s32.totalorder %s391_s7, 0 }
 0x1b2   :  { %395 = shalt.err (%p535_p4)  }
 0x1b3   :  { %397 = vsyncmov [#allocation2 + $0x8] }
 0x1b6   :  { %s398_s8 = vpop.sfrf %397 }
 0x1b7   :  { %p536_p5 = scmp.ne.s32.totalorder %s398_s8, 0 }
 0x1b9   :  { %402 = shalt.err (%p536_p5)  }
 0x1ba   :  { %404 = vsyncmov [#allocation2 + $0x9] }
 0x1bd   :  { %s405_s9 = vpop.sfrf %404 }
 0x1be   :  { %p537_p7 = scmp.ne.s32.totalorder %s405_s9, 0 }
 0x1c0   :  { %409 = shalt.err (%p537_p7)  }
 0x1c1   :  { %411 = vsyncmov [#allocation2 + $0xa] }
 0x1c4   :  { %s412_s13 = vpop.sfrf %411 }
 0x1c5   :  { %p538_p3 = scmp.ne.s32.totalorder %s412_s13, 0 }
 0x1c7   :  { %416 = shalt.err (%p538_p3)  }
 0x1c8   :  { %418 = vsyncmov [#allocation2 + $0xb] }
 0x1cb   :  { %s419_s10 = vpop.sfrf %418 }
 0x1cc   :  { %p539_p8 = scmp.ne.s32.totalorder %s419_s10, 0 }
 0x1ce   :  { %423 = shalt.err (%p539_p8)  }
 0x1cf   :  { %425 = vsyncmov [#allocation2 + $0xc] }
 0x1d2   :  { %s426_s11 = vpop.sfrf %425 }
 0x1d3   :  { %p540_p9 = scmp.ne.s32.totalorder %s426_s11, 0 }
 0x1d5   :  { %430 = shalt.err (%p540_p9)  }
 0x1d6   :  { %432 = vsyncmov [#allocation2 + $0xd] }
 0x1d9   :  { %s433_s15 = vpop.sfrf %432 }
 0x1da   :  { %p541_p10 = scmp.ne.s32.totalorder %s433_s15, 0 }
 0x1dc   :  { %437 = shalt.err (%p541_p10)  }
 0x1dd   :  { %439 = vsyncmov [#allocation2 + $0xe] }
 0x1e0   :  { %s440_s12 = vpop.sfrf %439 }
 0x1e1   :  { %p542_p11 = scmp.ne.s32.totalorder %s440_s12, 0 }
 0x1e3   :  { %444 = shalt.err (%p542_p11)  }
 0x1e4   :  { %446 = vsyncmov [#allocation2 + $0xf] }
 0x1e7   :  { %s447_s16 = vpop.sfrf %446 }
 0x1e8   :  { %p543_p12 = scmp.ne.s32.totalorder %s447_s16, 0 }
 0x1ea   :  { %451 = shalt.err (%p543_p12)  }

</bundles_post_ra>
